<compile_context>
chip_gen: v7x
topology: tpu7x:2x2x1
jax: 0.10.0
libtpu: 0.0.40
codegen_flags: <defaults>
</compile_context>

<pallas_src>
import functools

import jax
import jax.numpy as jnp
from jax import lax
from jax.experimental import pallas as pl
from jax.experimental.pallas import tpu as pltpu

PAD_IDX = 0          # index of '<pad>' in both vocabularies
_NEG_BIG = -1e30     # bias fill for padded vocab columns (exp -> 0, no inf*0)


def _round_up(x, m):
    return ((x + m - 1) // m) * m


# ----------------------------- Pallas kernel ------------------------------ #
def _loss_kernel(tgt_ref, bidx_ref, h_ref, w_ref, b_ref, out_ref,
                 m_sc, l_sc, g_sc, *, tm):
    """Grid = (M chunks, vocab tiles); vocab axis is an online-LSE reduction.

    tgt_ref : (m_chunk, 1) int32  target token per row (row = t * B + b)
    bidx_ref: (m_chunk, 1) int32  batch index per row
    h_ref   : (m_chunk, H) bf16   decoder hidden rows (VMEM-resident per chunk)
    w_ref   : (H, tv)      bf16   output projection weight tile (streamed once)
    b_ref   : (1, tv)      f32    output projection bias tile
    out_ref : (1, b_pad)   f32    per-chunk per-batch losses (lane-dense)
    m/l/g_sc: (m_chunk, 1) f32    running max / running sum-exp / target logit
    """
    j = pl.program_id(1)                      # vocab tile (reduction axis)
    n_v = pl.num_programs(1)
    tv = w_ref.shape[-1]
    m_chunk = h_ref.shape[0]
    n_inner = m_chunk // tm                   # static

    @pl.when(j == 0)
    def _init():
        m_sc[...] = jnp.full((m_chunk, 1), -jnp.inf, jnp.float32)
        l_sc[...] = jnp.zeros((m_chunk, 1), jnp.float32)
        g_sc[...] = jnp.zeros((m_chunk, 1), jnp.float32)

    col0 = j * tv

    def body(ii, carry):
        rows = pl.ds(pl.multiple_of(ii * tm, tm), tm)
        # (tm, H) @ (H, tv) on the MXU, f32 accumulation.
        logits = jnp.dot(h_ref[rows, :], w_ref[...],
                         preferred_element_type=jnp.float32)
        logits = logits + b_ref[...]                          # (tm, tv)

        tgt = tgt_ref[rows, :]                                # (tm, 1)
        col = lax.broadcasted_iota(jnp.int32, logits.shape, 1) + col0
        # fused target-logit gather (no (tm, tv) one-hot materialization)
        g_sc[rows, :] = g_sc[rows, :] + jnp.sum(
            jnp.where(col == tgt, logits, 0.0), axis=-1, keepdims=True)

        # online log-sum-exp across vocab tiles
        m_prev = m_sc[rows, :]
        m_new = jnp.maximum(m_prev, jnp.max(logits, axis=-1, keepdims=True))
        alpha = jnp.exp(m_prev - m_new)
        l_sc[rows, :] = alpha * l_sc[rows, :] + jnp.sum(
            jnp.exp(logits - m_new), axis=-1, keepdims=True)
        m_sc[rows, :] = m_new
        return carry

    lax.fori_loop(0, n_inner, body, 0)

    @pl.when(j == n_v - 1)
    def _finalize():
        lse = m_sc[...] + jnp.log(l_sc[...])                  # (m_chunk, 1)
        mask = (tgt_ref[...] != PAD_IDX).astype(jnp.float32)
        nll = (lse - g_sc[...]) * mask                        # (m_chunk, 1)
        # per-batch reduction: compare against a lane iota of batch ids and
        # sublane-reduce; output block is lane-dense (b_pad multiple of 128).
        b_pad = out_ref.shape[-1]
        bcol = lax.broadcasted_iota(jnp.int32, (m_chunk, b_pad), 1)
        out_ref[...] = jnp.sum(jnp.where(bcol == bidx_ref[...], nll, 0.0),
                               axis=0, keepdims=True)


def _pick_vmem_limit(m_chunk, H, tv, tm, b_pad):
    """Size the scoped VMEM limit from the real footprint, capped per chip."""
    bf16, f32 = 2, 4
    est = (2 * m_chunk * H * bf16           # resident hidden chunk (2 buffers)
           + 2 * H * tv * bf16              # streamed W tile (double buffered)
           + 2 * 8 * tv * f32               # bias tile
           + 2 * 2 * m_chunk * 128 * f32    # tgt + batch idx ((m,1) lane-padded)
           + 3 * m_chunk * 128 * f32        # online-LSE scratch (lane-padded)
           + 4 * tm * tv * f32              # logits / exp / where temporaries
           + 2 * 8 * b_pad * f32)           # output block
    try:
        phys = int(pltpu.get_tpu_info().vmem_capacity_bytes)
    except Exception:
        phys = 64 * 1024 * 1024             # conservative: v7x per-TC VMEM
    cap = max((phys * 3) // 4, 32 * 1024 * 1024)
    return int(min(max(32 * 1024 * 1024, (est * 5) // 4 + (2 << 20)), cap))


def prepare_output_projection(w_out, b_out, *, tv_max=2048):
    """One-time pad + bf16 cast of the output projection.

    Hoisted out of the per-call forward path (perf review): doing this inside
    the forward rewrites the full (H, V) weight in HBM on every call.
    """
    _, V = w_out.shape
    tv = min(tv_max, _round_up(V, 128))
    v_pad = _round_up(V, tv)
    w2 = jnp.pad(w_out.astype(jnp.bfloat16), ((0, 0), (0, v_pad - V)))
    b2 = jnp.pad(b_out.astype(jnp.float32).reshape(1, V),
                 ((0, 0), (0, v_pad - V)), constant_values=_NEG_BIG)
    return w2, b2, tv


def seq2seq_loss_pallas(dec_out, w_padded, b_padded, targets, *, tv,
                        tm_max=256, m_splits=1):
    """dec_out: (T-1, B, H) bf16/f32, targets: (T-1, B) int -> losses (B,) f32.

    m_splits: number of row chunks on the leading ("parallel") grid axis.
      1  -> W_out streamed from HBM exactly once (best for v5e / v6e, 1 TC).
      2  -> v7x megacore: each TensorCore streams W_out once over its half.
    """
    Tm1, B, H = dec_out.shape
    v_pad = w_padded.shape[1]
    assert v_pad % tv == 0
    n_v = v_pad // tv
    if Tm1 == 0:
        return jnp.zeros((B,), jnp.float32)

    # Fold time into the matmul M dimension: row index = t * B + b.
    M = Tm1 * B
    tm = min(tm_max, _round_up(M, 8))
    n_tiles = _round_up(pl.cdiv(M, tm), m_splits)
    m_pad = n_tiles * tm
    m_chunk = m_pad // m_splits
    b_pad = _round_up(B, 128)               # lane-dense per-batch output

    h2 = jnp.pad(dec_out.reshape(M, H).astype(jnp.bfloat16),
                 ((0, m_pad - M), (0, 0)))
    tgt2 = jnp.pad(targets.astype(jnp.int32).reshape(M, 1),
                   ((0, m_pad - M), (0, 0)), constant_values=PAD_IDX)
    # NOTE: batch indices stay a (M, 1) input; in-kernel (row % B) would need
    # an integer modulo the VPU does not lower cheaply / reliably.
    bidx = jnp.tile(jnp.arange(B, dtype=jnp.int32), Tm1).reshape(M, 1)
    bidx = jnp.pad(bidx, ((0, m_pad - M), (0, 0)))  # padded rows are PAD-masked

    out = pl.pallas_call(
        functools.partial(_loss_kernel, tm=tm),
        out_shape=jax.ShapeDtypeStruct((m_splits, b_pad), jnp.float32),
        grid_spec=pltpu.PrefetchScalarGridSpec(
            num_scalar_prefetch=0,
            grid=(m_splits, n_v),                       # vocab reduction last
            in_specs=[
                pl.BlockSpec((m_chunk, 1), lambda mo, j: (mo, 0)),  # targets
                pl.BlockSpec((m_chunk, 1), lambda mo, j: (mo, 0)),  # batch ids
                pl.BlockSpec((m_chunk, H), lambda mo, j: (mo, 0)),  # hidden rows
                pl.BlockSpec((H, tv),      lambda mo, j: (0, j)),   # W_out tile
                pl.BlockSpec((1, tv),      lambda mo, j: (0, j)),   # bias tile
            ],
            out_specs=pl.BlockSpec((1, b_pad), lambda mo, j: (mo, 0)),
            scratch_shapes=[pltpu.VMEM((m_chunk, 1), jnp.float32)] * 3,
        ),
        compiler_params=pltpu.CompilerParams(
            dimension_semantics=("parallel", "arbitrary"),
            vmem_limit_bytes=_pick_vmem_limit(m_chunk, H, tv, tm, b_pad)),
    )(tgt2, bidx, h2, w_padded, b_padded)

    # tiny final reduce over chunks; drop padded batch lanes
    return jnp.sum(out, axis=0)[:B]


# ------------------------ encoder / decoder (glue) ------------------------ #
def init_params(key, vocab_size, emb_dim, hidden):
    ks = jax.random.split(key, 8)
    s = 0.1
    n = lambda k, shp: (jax.random.normal(k, shp, jnp.float32) * s)
    return dict(
        E_src=n(ks[0], (vocab_size, emb_dim)),
        E_tgt=n(ks[1], (vocab_size, emb_dim)),
        enc_Wih=n(ks[2], (emb_dim, hidden)),
        enc_Whh=n(ks[3], (hidden, hidden)),
        enc_b=jnp.zeros((hidden,), jnp.float32),
        dec_Wih=n(ks[4], (emb_dim, hidden)),
        dec_Whh=n(ks[5], (hidden, hidden)),
        dec_b=jnp.zeros((hidden,), jnp.float32),
        W_c=n(ks[6], (2 * hidden, hidden)),
        W_out=n(ks[7], (hidden, vocab_size)),
        b_out=jnp.zeros((vocab_size,), jnp.float32),
    )


def encoder_fwd(params, src):
    # TODO(synk): pack_padded_sequence (skipping pads inside the encoder RNN)
    # has no clean equivalent; padded positions are handled via the attention
    # mask instead, matching enc_mask usage in the reference forward.
    emb = params["E_src"][src]                               # (T_src, B, D)
    B = src.shape[1]
    H = params["enc_Whh"].shape[0]

    def step(h, x):
        h_new = jnp.tanh(x @ params["enc_Wih"] + h @ params["enc_Whh"]
                         + params["enc_b"])
        return h_new, h_new

    h0 = jnp.zeros((B, H), jnp.float32)
    h_last, enc_hidden = lax.scan(step, h0, emb)
    return enc_hidden, h_last                                # (T_src,B,H),(B,H)


def decoder_fwd(params, tgt_in, enc_hidden, h0, enc_mask):
    emb = params["E_tgt"][tgt_in]                            # (T-1, B, D)
    enc_h_bt = jnp.transpose(enc_hidden, (1, 0, 2))          # (B, T_src, H)
    neg_inf = jnp.float32(-1e9)

    def step(h, x):
        h_new = jnp.tanh(x @ params["dec_Wih"] + h @ params["dec_Whh"]
                         + params["dec_b"])
        scores = jnp.einsum("bth,bh->bt", enc_h_bt, h_new)
        scores = jnp.where(enc_mask > 0, neg_inf, scores)    # mask <pad>
        alpha = jax.nn.softmax(scores, axis=-1)
        ctx = jnp.einsum("bt,bth->bh", alpha, enc_h_bt)
        o = jnp.tanh(jnp.concatenate([h_new, ctx], axis=-1) @ params["W_c"])
        # emit bf16 directly (kernel matmul operand dtype) - halves writeback
        return h_new, o.astype(jnp.bfloat16)

    _, outs = lax.scan(step, h0, emb)
    return outs                                              # (T-1, B, H) bf16


def seq2seq_forward(params, w_proj, b_proj, source_sentences, target_sentences,
                    source_lengths, *, tv, tm_max=256, m_splits=1):
    """Mirrors SequenceToSequenceModel.forward; returns losses of shape (B,)."""
    del source_lengths  # see TODO(synk) in encoder_fwd
    enc_hidden, dec_init_state = encoder_fwd(params, source_sentences)
    enc_mask = (source_sentences == PAD_IDX).astype(jnp.float32).T  # (B, T_src)
    dec_out = decoder_fwd(params, target_sentences[:-1], enc_hidden,
                          dec_init_state, enc_mask)
    return seq2seq_loss_pallas(dec_out, w_proj, b_proj, target_sentences[1:],
                               tv=tv, tm_max=tm_max, m_splits=m_splits)


# Pure-JAX reference of the loss tail (for correctness check of the kernel).
def _loss_ref(dec_out, w_out, b_out, targets):
    P = jnp.einsum("tbh,hv->tbv", dec_out.astype(jnp.float32), w_out) + b_out
    nls = -jax.nn.log_softmax(P, axis=2)
    gathered = jnp.take_along_axis(nls, targets[:, :, None], axis=2)[..., 0]
    mask = (targets != PAD_IDX).astype(jnp.float32)
    return (gathered * mask).sum(axis=0)


if __name__ == "__main__":
    VOCAB, EMB, HID = 64, 32, 32
    T_SRC, T_TGT, B = 8, 8, 4

    key = jax.random.PRNGKey(0)
    kp, ks, kt = jax.random.split(key, 3)
    params = init_params(kp, VOCAB, EMB, HID)

    # one-time pad + bf16 cast of the output projection (hoisted out of the
    # per-call forward path)
    w_proj, b_proj, TV = prepare_output_projection(
        params["W_out"], params["b_out"], tv_max=2048)

    # (max_source_length, batch) / (max_target_length, batch) int token ids,
    # with trailing <pad> (=0) tokens of varying length per sentence.
    src = jax.random.randint(ks, (T_SRC, B), 1, VOCAB, dtype=jnp.int32)
    tgt = jax.random.randint(kt, (T_TGT, B), 1, VOCAB, dtype=jnp.int32)
    src_len = jnp.array([8, 7, 6, 5], jnp.int32)
    tgt_len = jnp.array([8, 8, 6, 7], jnp.int32)
    src = jnp.where(jnp.arange(T_SRC)[:, None] < src_len[None, :], src, PAD_IDX)
    tgt = jnp.where(jnp.arange(T_TGT)[:, None] < tgt_len[None, :], tgt, PAD_IDX)
    source_lengths = [int(x) for x in src_len]

    fwd = jax.jit(functools.partial(seq2seq_forward, tv=TV))
    losses = fwd(params, w_proj, b_proj, src, tgt, source_lengths)
    losses = jax.block_until_ready(losses)

    # verify the Pallas loss tail against a pure-JAX f32 reference
    # (kernel matmul uses bf16 operands with f32 accumulation -> loose tol)
    enc_hidden, dec_init = encoder_fwd(params, src)
    enc_mask = (src == PAD_IDX).astype(jnp.float32).T
    dec_out = decoder_fwd(params, tgt[:-1], enc_hidden, dec_init, enc_mask)
    ref = _loss_ref(dec_out, params["W_out"], params["b_out"], tgt[1:])
    assert losses.shape == (B,)
    assert jnp.allclose(losses, ref, rtol=3e-2, atol=3e-2), (losses, ref)

    print("KERNEL_OK")
</pallas_src>

<mosaic_0001>
module attributes {stable_mosaic.version = 11 : i64} {
  func.func @_loss_kernel(%arg0: i32, %arg1: i32, %arg2: memref<32x1xi32, #tpu.memory_space<vmem>>, %arg3: memref<32x1xi32, #tpu.memory_space<vmem>>, %arg4: memref<32x32xbf16, #tpu.memory_space<vmem>>, %arg5: memref<32x128xbf16, #tpu.memory_space<vmem>>, %arg6: memref<1x128xf32, #tpu.memory_space<vmem>>, %arg7: memref<1x128xf32, #tpu.memory_space<vmem>>, %arg8: memref<32x1xf32, #tpu.memory_space<vmem>>, %arg9: memref<32x1xf32, #tpu.memory_space<vmem>>, %arg10: memref<32x1xf32, #tpu.memory_space<vmem>>) attributes {dimension_semantics = [#tpu.dimension_semantics<parallel>, #tpu.dimension_semantics<arbitrary>], iteration_bounds = array<i64: 1, 1>, scalar_prefetch = 0 : i64, scratch_operands = 3 : i64, tpu.core_type = #tpu.core_type<tc>, window_params = [{transform_indices = @transform_0, window_bounds = array<i64: 32, 1>}, {transform_indices = @transform_1, window_bounds = array<i64: 32, 1>}, {transform_indices = @transform_2, window_bounds = array<i64: 32, 32>}, {transform_indices = @transform_3, window_bounds = array<i64: 32, 128>}, {transform_indices = @transform_4, window_bounds = array<i64: 1, 128>}, {transform_indices = @transform_5, window_bounds = array<i64: 1, 128>}]} {
    %c0_i32 = arith.constant 0 : i32
    %0 = arith.cmpi eq, %arg1, %c0_i32 : i32
    %1 = arith.extui %0 : i1 to i32
    %c0_i32_0 = arith.constant 0 : i32
    %2 = arith.cmpi ne, %1, %c0_i32_0 : i32
    scf.if %2 {
      %cst_19 = arith.constant 0xFF800000 : f32
      %52 = vector.broadcast %cst_19 : f32 to vector<32x1xf32>
      %c0_20 = arith.constant 0 : index
      %c0_21 = arith.constant 0 : index
      %53 = vector.load %arg8[%c0_20, %c0_21] : memref<32x1xf32, #tpu.memory_space<vmem>>, vector<32x1xf32>
      tpu.vector_store %arg8[%c0_20, %c0_21], %52 {strides = array<i32>} : memref<32x1xf32, #tpu.memory_space<vmem>>, vector<32x1xf32>,
      %cst_22 = arith.constant 0.000000e+00 : f32
      %54 = vector.broadcast %cst_22 : f32 to vector<32x1xf32>
      %c0_23 = arith.constant 0 : index
      %c0_24 = arith.constant 0 : index
      %55 = vector.load %arg9[%c0_23, %c0_24] : memref<32x1xf32, #tpu.memory_space<vmem>>, vector<32x1xf32>
      tpu.vector_store %arg9[%c0_23, %c0_24], %54 {strides = array<i32>} : memref<32x1xf32, #tpu.memory_space<vmem>>, vector<32x1xf32>,
      %cst_25 = arith.constant 0.000000e+00 : f32
      %56 = vector.broadcast %cst_25 : f32 to vector<32x1xf32>
      %c0_26 = arith.constant 0 : index
      %c0_27 = arith.constant 0 : index
      %57 = vector.load %arg10[%c0_26, %c0_27] : memref<32x1xf32, #tpu.memory_space<vmem>>, vector<32x1xf32>
      tpu.vector_store %arg10[%c0_26, %c0_27], %56 {strides = array<i32>} : memref<32x1xf32, #tpu.memory_space<vmem>>, vector<32x1xf32>,
    } else {
    }
    %c128_i32 = arith.constant 128 : i32
    %3 = arith.muli %arg1, %c128_i32 : i32
    %c0_i32_1 = arith.constant 0 : i32
    %c32_i32 = arith.constant 32 : i32
    %4 = arith.muli %c0_i32_1, %c32_i32 : i32
    %5 = tpu.assume_multiple %4, 32 : i32
    %6 = arith.index_cast %5 : i32 to index
    %c0 = arith.constant 0 : index
    %7 = vector.load %arg4[%6, %c0] : memref<32x32xbf16, #tpu.memory_space<vmem>>, vector<32x32xbf16>
    %c0_2 = arith.constant 0 : index
    %c0_3 = arith.constant 0 : index
    %8 = vector.load %arg5[%c0_2, %c0_3] : memref<32x128xbf16, #tpu.memory_space<vmem>>, vector<32x128xbf16>
    %cst = arith.constant dense<0.000000e+00> : vector<32x128xf32>
    %9 = tpu.matmul %7, %8, %cst {dimension_numbers = #tpu.dot_dimension_numbers<[1], [0], [0], [1], [0, 0, 1, 1], [], []>} : vector<32x32xbf16>, vector<32x128xbf16>, vector<32x128xf32> -> vector<32x128xf32>
    %c0_4 = arith.constant 0 : index
    %c0_5 = arith.constant 0 : index
    %10 = vector.load %arg6[%c0_4, %c0_5] : memref<1x128xf32, #tpu.memory_space<vmem>>, vector<1x128xf32>
    %11 = vector.broadcast %10 : vector<1x128xf32> to vector<32x128xf32>
    %12 = arith.addf %9, %11 : vector<32x128xf32>
    %13 = arith.index_cast %5 : i32 to index
    %c0_6 = arith.constant 0 : index
    %14 = vector.load %arg2[%13, %c0_6] : memref<32x1xi32, #tpu.memory_space<vmem>>, vector<32x1xi32>
    %15 = tpu.iota {dimensions = array<i32: 1>} : vector<32x128xi32>
    %16 = vector.broadcast %3 : i32 to vector<32x128xi32>
    %17 = arith.addi %15, %16 : vector<32x128xi32>
    %18 = arith.index_cast %5 : i32 to index
    %c0_7 = arith.constant 0 : index
    %19 = vector.load %arg10[%18, %c0_7] : memref<32x1xf32, #tpu.memory_space<vmem>>, vector<32x1xf32>
    %20 = vector.broadcast %14 : vector<32x1xi32> to vector<32x128xi32>
    %21 = arith.cmpi eq, %17, %20 : vector<32x128xi32>
    %cst_8 = arith.constant 0.000000e+00 : f32
    %22 = vector.broadcast %cst_8 : f32 to vector<32x128xf32>
    %23 = arith.select %21, %12, %22 : vector<32x128xi1>, vector<32x128xf32>
    %cst_9 = arith.constant dense<0.000000e+00> : vector<32xf32>
    %24 = vector.multi_reduction <add>, %23, %cst_9 [1] : vector<32x128xf32> to vector<32xf32>
    %25 = vector.shape_cast %24 : vector<32xf32> to vector<32x1xf32>
    %26 = arith.addf %19, %25 : vector<32x1xf32>
    %27 = arith.index_cast %5 : i32 to index
    %c0_10 = arith.constant 0 : index
    %28 = vector.load %arg10[%27, %c0_10] : memref<32x1xf32, #tpu.memory_space<vmem>>, vector<32x1xf32>
    tpu.vector_store %arg10[%27, %c0_10], %26 {strides = array<i32>} : memref<32x1xf32, #tpu.memory_space<vmem>>, vector<32x1xf32>,
    %29 = arith.index_cast %5 : i32 to index
    %c0_11 = arith.constant 0 : index
    %30 = vector.load %arg8[%29, %c0_11] : memref<32x1xf32, #tpu.memory_space<vmem>>, vector<32x1xf32>
    %cst_12 = arith.constant dense<0xFF800000> : vector<32xf32>
    %31 = vector.multi_reduction <maximumf>, %12, %cst_12 [1] : vector<32x128xf32> to vector<32xf32>
    %32 = vector.shape_cast %31 : vector<32xf32> to vector<32x1xf32>
    %33 = arith.maximumf %30, %32 : vector<32x1xf32>
    %34 = arith.subf %30, %33 : vector<32x1xf32>
    %35 = math.exp %34 : vector<32x1xf32>
    %36 = arith.index_cast %5 : i32 to index
    %c0_13 = arith.constant 0 : index
    %37 = vector.load %arg9[%36, %c0_13] : memref<32x1xf32, #tpu.memory_space<vmem>>, vector<32x1xf32>
    %38 = arith.mulf %35, %37 : vector<32x1xf32>
    %39 = vector.broadcast %33 : vector<32x1xf32> to vector<32x128xf32>
    %40 = arith.subf %12, %39 : vector<32x128xf32>
    %41 = math.exp %40 : vector<32x128xf32>
    %cst_14 = arith.constant dense<0.000000e+00> : vector<32xf32>
    %42 = vector.multi_reduction <add>, %41, %cst_14 [1] : vector<32x128xf32> to vector<32xf32>
    %43 = vector.shape_cast %42 : vector<32xf32> to vector<32x1xf32>
    %44 = arith.addf %38, %43 : vector<32x1xf32>
    %45 = arith.index_cast %5 : i32 to index
    %c0_15 = arith.constant 0 : index
    %46 = vector.load %arg9[%45, %c0_15] : memref<32x1xf32, #tpu.memory_space<vmem>>, vector<32x1xf32>
    tpu.vector_store %arg9[%45, %c0_15], %44 {strides = array<i32>} : memref<32x1xf32, #tpu.memory_space<vmem>>, vector<32x1xf32>,
    %47 = arith.index_cast %5 : i32 to index
    %c0_16 = arith.constant 0 : index
    %48 = vector.load %arg8[%47, %c0_16] : memref<32x1xf32, #tpu.memory_space<vmem>>, vector<32x1xf32>
    tpu.vector_store %arg8[%47, %c0_16], %33 {strides = array<i32>} : memref<32x1xf32, #tpu.memory_space<vmem>>, vector<32x1xf32>,
    %c1_i32 = arith.constant 1 : i32
    %c0_i32_17 = arith.constant 0 : i32
    %49 = arith.cmpi eq, %arg1, %c0_i32_17 : i32
    %50 = arith.extui %49 : i1 to i32
    %c0_i32_18 = arith.constant 0 : i32
    %51 = arith.cmpi ne, %50, %c0_i32_18 : i32
    scf.if %51 {
      %c0_19 = arith.constant 0 : index
      %c0_20 = arith.constant 0 : index
      %52 = vector.load %arg8[%c0_19, %c0_20] : memref<32x1xf32, #tpu.memory_space<vmem>>, vector<32x1xf32>
      %c0_21 = arith.constant 0 : index
      %c0_22 = arith.constant 0 : index
      %53 = vector.load %arg9[%c0_21, %c0_22] : memref<32x1xf32, #tpu.memory_space<vmem>>, vector<32x1xf32>
      %54 = math.log %53 : vector<32x1xf32>
      %55 = arith.addf %52, %54 : vector<32x1xf32>
      %c0_23 = arith.constant 0 : index
      %c0_24 = arith.constant 0 : index
      %56 = vector.load %arg2[%c0_23, %c0_24] : memref<32x1xi32, #tpu.memory_space<vmem>>, vector<32x1xi32>
      %c0_i32_25 = arith.constant 0 : i32
      %57 = vector.broadcast %c0_i32_25 : i32 to vector<32x1xi32>
      %58 = arith.cmpi ne, %56, %57 : vector<32x1xi32>
      %59 = arith.extui %58 : vector<32x1xi1> to vector<32x1xi32>
      %60 = arith.sitofp %59 : vector<32x1xi32> to vector<32x1xf32>
      %c0_26 = arith.constant 0 : index
      %c0_27 = arith.constant 0 : index
      %61 = vector.load %arg10[%c0_26, %c0_27] : memref<32x1xf32, #tpu.memory_space<vmem>>, vector<32x1xf32>
      %62 = arith.subf %55, %61 : vector<32x1xf32>
      %63 = arith.mulf %62, %60 : vector<32x1xf32>
      %64 = tpu.iota {dimensions = array<i32: 1>} : vector<32x128xi32>
      %c0_28 = arith.constant 0 : index
      %c0_29 = arith.constant 0 : index
      %65 = vector.load %arg3[%c0_28, %c0_29] : memref<32x1xi32, #tpu.memory_space<vmem>>, vector<32x1xi32>
      %66 = vector.broadcast %65 : vector<32x1xi32> to vector<32x128xi32>
      %67 = arith.cmpi eq, %64, %66 : vector<32x128xi32>
      %cst_30 = arith.constant 0.000000e+00 : f32
      %68 = vector.shape_cast %63 : vector<32x1xf32> to vector<32x1xf32>
      %69 = vector.broadcast %68 : vector<32x1xf32> to vector<32x128xf32>
      %70 = vector.broadcast %cst_30 : f32 to vector<32x128xf32>
      %71 = arith.select %67, %69, %70 : vector<32x128xi1>, vector<32x128xf32>
      %cst_31 = arith.constant dense<0.000000e+00> : vector<128xf32>
      %72 = vector.multi_reduction <add>, %71, %cst_31 [0] : vector<32x128xf32> to vector<128xf32>
      %73 = vector.shape_cast %72 : vector<128xf32> to vector<1x128xf32>
      %c0_32 = arith.constant 0 : index
      %c0_33 = arith.constant 0 : index
      %74 = vector.load %arg7[%c0_32, %c0_33] : memref<1x128xf32, #tpu.memory_space<vmem>>, vector<1x128xf32>
      tpu.vector_store %arg7[%c0_32, %c0_33], %73 {strides = array<i32>} : memref<1x128xf32, #tpu.memory_space<vmem>>, vector<1x128xf32>,
    } else {
    }
    return
  }
  func.func @transform_0(%arg0: i32, %arg1: i32) -> (i32, i32) {
    %c0_i32 = arith.constant 0 : i32
    %c0_i32_0 = arith.constant 0 : i32
    return %arg0, %c0_i32 : i32, i32
  }
  func.func @transform_1(%arg0: i32, %arg1: i32) -> (i32, i32) {
    %c0_i32 = arith.constant 0 : i32
    %c0_i32_0 = arith.constant 0 : i32
    return %arg0, %c0_i32 : i32, i32
  }
  func.func @transform_2(%arg0: i32, %arg1: i32) -> (i32, i32) {
    %c0_i32 = arith.constant 0 : i32
    %c0_i32_0 = arith.constant 0 : i32
    return %arg0, %c0_i32 : i32, i32
  }
  func.func @transform_3(%arg0: i32, %arg1: i32) -> (i32, i32) {
    %c0_i32 = arith.constant 0 : i32
    %c0_i32_0 = arith.constant 0 : i32
    return %c0_i32, %arg1 : i32, i32
  }
  func.func @transform_4(%arg0: i32, %arg1: i32) -> (i32, i32) {
    %c0_i32 = arith.constant 0 : i32
    %c0_i32_0 = arith.constant 0 : i32
    return %c0_i32, %arg1 : i32, i32
  }
  func.func @transform_5(%arg0: i32, %arg1: i32) -> (i32, i32) {
    %c0_i32 = arith.constant 0 : i32
    %c0_i32_0 = arith.constant 0 : i32
    return %arg0, %c0_i32 : i32, i32
  }
}

</mosaic_0001>

<bundles_post_ra>
// kernel: custom-call.6
= control target key start
LH: loop header
LB: loop body
LE: loop exit
PB: predicated region body
PF: predicated region fallthrough
CT: control target
= control target key end

     0   :  { %s6_s0 = inlined_call_operand.vmem [shape: f32[8,4,32], index: 0, kind: output, shape index: {}]  }

// kernel: custom-call
= control target key start
LH: loop header
LB: loop body
LE: loop exit
PB: predicated region body
PF: predicated region fallthrough
CT: control target
= control target key end

     0   :  { %s6_s0 = inlined_call_operand.vmem [shape: f32[4,32], index: 0, kind: output, shape index: {}]  }

// kernel: custom-call.5
= control target key start
LH: loop header
LB: loop body
LE: loop exit
PB: predicated region body
PF: predicated region fallthrough
CT: control target
= control target key end

     0   :  { %s6_s0 = inlined_call_operand.vmem [shape: bf16[7,4,32], index: 0, kind: output, shape index: {}]  }

// kernel: seq2seq_forward.1
= control target key start
LH: loop header
LB: loop body
LE: loop exit
PB: predicated region body
PF: predicated region fallthrough
CT: control target
= control target key end

     0   :  { %vm76_vm0 = vcmask 261120   ;;  %vm25_vm1 = vcmask 7168   ;;  %v434_v4 = vmov -inf   ;;  %v435_v14 = vmov 0   ;;  %s639_s3 = inlined_call_operand.vmem [shape: bf16[32,128], index: 3, kind: input, shape index: {}]   ;;  %s640_s2 = inlined_call_operand.vmem [shape: bf16[32,32], index: 2, kind: input, shape index: {}]   ;;  %s641_s4 = inlined_call_operand.vmem [shape: f32[1,128], index: 4, kind: input, shape index: {}]   ;;  %s642_s0 = inlined_call_operand.vmem [shape: s32[32,1], index: 0, kind: input, shape index: {}]   ;;  %s643_s1 = inlined_call_operand.vmem [shape: s32[32,1], index: 1, kind: input, shape index: {}]   ;;  %s644_s5 = inlined_call_operand.vmem [shape: f32[1,128], index: 5, kind: output, shape index: {}]  }
   0x1   :  { %v406_v0 = vld [vmem:[%s639_s3] sm:$0xff]   ;;  %v407_v1 = vld [vmem:[%s639_s3 + $0x8] sm:$0xff]   ;;  %28 = vst.msk [vmem:[#allocation2 + $0x10] sm:$0xff] %vm25_vm1, %v434_v4  ;;  %26 = vst.msk [vmem:[#allocation2] sm:$0xff] %vm25_vm1, %v434_v4  ;;  %405 = vset.pattern.permute.xlu1 %v435_v14  ;;  %404 = vset.pattern.permute.xlu0 %v435_v14  ;;  %v436_v15 = vmov 0.0   ;;  %v136_v50 = vlaneseq }
   0x2   :  { %393 = vmatprep.subr.bf16.mxu0 %v406_v0  ;;  %v408_v2 = vld [vmem:[%s640_s2] sm:$0xff]   ;;  %v409_v3 = vld [vmem:[%s640_s2 + $0x8] sm:$0xff]   ;;  %27 = vst.msk [vmem:[#allocation2 + $0x8] sm:$0xff] %vm25_vm1, %v434_v4  ;;  %29 = vst.msk [vmem:[#allocation2 + $0x18] sm:$0xff] %vm25_vm1, %v434_v4 }
   0x3   :  { %394 = vmatpush3.bf16.msra.mxu0 %v406_v0  ;;  %397 = vmatprep.mubr.msk.bf16.mxu0 %vm76_vm0, %v408_v2  ;;  %v378_v5 = vld [vmem:[%s641_s4] ss:$0 sm:$0xff]  ;;  %30 = vst.msk [vmem:[#allocation3] sm:$0xff] %vm25_vm1, %v436_v15  ;;  %31 = vst.msk [vmem:[#allocation3 + $0x8] sm:$0xff] %vm25_vm1, %v436_v15  ;;  %v563_v33 = vld [vmem:[%s642_s0 + $0x8] sm:$0xff]  ;;  %v582_v53 = vand.u32 127, %v136_v50 }
   0x4   :  { %395 = vmatprep.subr.bf16.mxu0 %v407_v1  ;;  %32 = vst.msk [vmem:[#allocation3 + $0x10] sm:$0xff] %vm25_vm1, %v436_v15  ;;  %33 = vst.msk [vmem:[#allocation3 + $0x18] sm:$0xff] %vm25_vm1, %v436_v15  ;;  %v557_v32 = vld [vmem:[%s642_s0] sm:$0xff]  ;;  %v569_v34 = vld [vmem:[%s642_s0 + $0x10] sm:$0xff]  ;;  %vm297_vm8 = vcmp.ne.s32.totalorder %v563_v33, 0 }
   0x5   :  { %34 = vst.msk [vmem:[#allocation4] sm:$0xff] %vm25_vm1, %v436_v15  ;;  %35 = vst.msk [vmem:[#allocation4 + $0x8] sm:$0xff] %vm25_vm1, %v436_v15  ;;  %v575_v35 = vld [vmem:[%s642_s0 + $0x18] sm:$0xff]  ;;  %v321_v62 = vld [vmem:[%s643_s1 + $0x8] sm:$0xff]  ;;  %vm296_vm6 = vcmp.ne.s32.totalorder %v557_v32, 0  ;;  %vm298_vm7 = vcmp.ne.s32.totalorder %v569_v34, 0 }
   0x6   :  { %36 = vst.msk [vmem:[#allocation4 + $0x10] sm:$0xff] %vm25_vm1, %v436_v15  ;;  %37 = vst.msk [vmem:[#allocation4 + $0x18] sm:$0xff] %vm25_vm1, %v436_v15  ;;  %v322_v63 = vld [vmem:[%s643_s1 + $0x10] sm:$0xff]  ;;  %v320_v0 = vld [vmem:[%s643_s1] sm:$0xff]  ;;  %vm299_vm9 = vcmp.ne.s32.totalorder %v575_v35, 0 }
   0x7   :  { %396 = vmatpush3.bf16.msra.mxu0 %v407_v1 }
   0x8   :  { %v514_v16 = vld [vmem:[#allocation2 + $0x10] sm:$0xff]  ;;  %v516_v17 = vld [vmem:[#allocation2] sm:$0xff] }
   0x9   :  { %v524_v22 = vld [vmem:[#allocation2 + $0x18] sm:$0xff]  ;;  %v531_v24 = vld [vmem:[#allocation2 + $0x8] sm:$0xff] }
   0xa   :  { %398 = vmatmul.mubr.msk.bf16.vlgmr.msra.gmra.mrb[0].mxu0 %vm76_vm0, %v409_v3 }
  0xdd   :  { %v399_v6 = vpop.f32.mrb[0].mxu0 }
  0xde   :  { %v486_v7 = vadd.f32 %v399_v6, %v378_v5  ;;  %v117_v8 = vpop.f32.mrb[1].mxu0  ;;  %v209_v6 = vld [vmem:[#allocation3] sm:$0xff] }
  0xdf   :  { %v488_v9 = vadd.f32 %v378_v5, %v117_v8  ;;  %v400_v10 = vpop.f32.mrb[2].mxu0 }
  0xe0   :  { %189 = vmax.xlane.f32.xlu1 %v486_v7  ;;  %v120_v11 = vpop.f32.mrb[3].mxu0  ;;  %v492_v12 = vadd.f32 %v400_v10, %v378_v5  ;;  %v210_v10 = vld [vmem:[#allocation3 + $0x8] sm:$0xff] }
  0xe1   :  { %185 = vmax.xlane.f32.xlu0 %v488_v9  ;;  %v494_v13 = vadd.f32 %v378_v5, %v120_v11 }
  0xe4   :  { %191 = vmax.xlane.f32.xlu1 %v492_v12 }
  0xe5   :  { %187 = vmax.xlane.f32.xlu0 %v494_v13 }
 0x16d   :  { %v190_v18 = vpop.xlane.xlu1 %189 }
 0x16e   :  { %v519_v19 = vmax.f32 %v514_v16, %v190_v18  ;;  %v186_v20 = vpop.xlane.xlu0 %185  ;;  %v212_v18 = vld [vmem:[#allocation3 + $0x18] sm:$0xff] }
 0x16f   :  { %v522_v21 = vmax.f32 %v516_v17, %v186_v20 }
 0x170   :  { %v199_v23 = vsub.f32 %v514_v16, %v519_v19  ;;  %267 = vst.msk [vmem:[#allocation2 + $0x10] sm:$0xff] %vm25_vm1, %v519_v19  ;;  %229 = vperm.xlu1 %405, %v519_v19  }
 0x171   :  { %v197_v25 = vsub.f32 %v516_v17, %v522_v21  ;;  %265 = vst.msk [vmem:[#allocation2] sm:$0xff] %vm25_vm1, %v522_v21  ;;  %v192_v26 = vpop.xlane.xlu1 %191  ;;  %219 = vperm.xlu0 %404, %v522_v21   ;;  %v211_v17 = vld [vmem:[#allocation3 + $0x10] sm:$0xff] }
 0x172   :  { %v539_v27 = vmax.f32 %v524_v22, %v192_v26  ;;  %v188_v28 = vpop.xlane.xlu0 %187  ;;  %v205_v3 = vmul.f32 1.442695, %v199_v23  ;;  %v140_v26 = vld [vmem:[#allocation4] sm:$0xff] }
 0x173   :  { %v542_v29 = vmax.f32 %v531_v24, %v188_v28  ;;  %v201_v1 = vmul.f32 1.442695, %v197_v25 }
 0x174   :  { %v200_v30 = vsub.f32 %v524_v22, %v539_v27  ;;  %268 = vst.msk [vmem:[#allocation2 + $0x18] sm:$0xff] %vm25_vm1, %v539_v27 }
 0x175   :  { %v198_v31 = vsub.f32 %v531_v24, %v542_v29  ;;  %266 = vst.msk [vmem:[#allocation2 + $0x8] sm:$0xff] %vm25_vm1, %v542_v29  ;;  %224 = vperm.xlu1 %405, %v542_v29  }
 0x176   :  { %v207_v4 = vmul.f32 1.442695, %v200_v30 }
 0x177   :  { %v203_v2 = vmul.f32 1.442695, %v198_v31 }
 0x179   :  { %234 = vperm.xlu1 %405, %v539_v27   ;;  %v141_v27 = vld [vmem:[#allocation4 + $0x8] sm:$0xff] }
 0x17d   :  { %145 = vperm.xlu1 %405, %v557_v32   ;;  %v274_v32 = vld [vmem:[#allocation2 + $0x10] sm:$0xff] }
 0x181   :  { %148 = vperm.xlu1 %405, %v563_v33  }
 0x185   :  { %151 = vperm.xlu1 %405, %v569_v34  }
 0x189   :  { %154 = vperm.xlu1 %405, %v575_v35  }
 0x1ef   :  { %v230_v36 = vpop.permute.xlu1 %229 }
 0x1f0   :  { %v220_v37 = vpop.permute.xlu0 %219  ;;  %v239_v40 = vsub.f32 %v486_v7, %v230_v36 }
 0x1f1   :  { %v237_v38 = vsub.f32 %v488_v9, %v220_v37  ;;  %v142_v37 = vld [vmem:[#allocation4 + $0x10] sm:$0xff] }
 0x1f2   :  { %v245_v44 = vmul.f32 1.442695, %v239_v40 }
 0x1f3   :  { %v241_v39 = vmul.f32 1.442695, %v237_v38  ;;  %v143_v38 = vld [vmem:[#allocation4 + $0x18] sm:$0xff] }
 0x1f4   :  { %v225_v41 = vpop.permute.xlu1 %224 }
 0x1f5   :  { %410 = vpow2.f32 %v241_v39  ;;  %v238_v42 = vsub.f32 %v494_v13, %v225_v41 }
 0x1f7   :  { %v243_v43 = vmul.f32 1.442695, %v238_v42 }
 0x1f8   :  { %v235_v45 = vpop.permute.xlu1 %234 }
 0x1f9   :  { %412 = vpow2.f32 %v243_v43  ;;  %v240_v46 = vsub.f32 %v492_v12, %v235_v45 }
 0x1fa   :  { %414 = vpow2.f32 %v245_v44 }
 0x1fb   :  { %v247_v47 = vmul.f32 1.442695, %v240_v46 }
 0x1fc   :  { %v146_v48 = vpop.permute.xlu1 %145 }
 0x1fd   :  { %416 = vpow2.f32 %v247_v47  ;;  %vm156_vm2 = vcmp.eq.s32.totalorder %v582_v53, %v146_v48  ;;  %v272_v48 = vld [vmem:[#allocation2] sm:$0xff] }
 0x1fe   :  { %v160_v58 = vsel %vm156_vm2, %v488_v9, 0.0  ;;  %418 = vpow2.f32 %v201_v1  ;;  %v387_v1 = vsel %vm298_vm7, 1.0, %v436_v15 }
 0x1ff   :  { %v411_v49 = vpop.eup %410  ;;  %420 = vpow2.f32 %v203_v2 }
 0x200   :  { %249 = vadd.xlane.f32.xlu1 %v411_v49  ;;  %v149_v51 = vpop.permute.xlu1 %148  ;;  %422 = vpow2.f32 %v205_v3 }
 0x201   :  { %vm157_vm3 = vcmp.eq.s32.totalorder %v582_v53, %v149_v51  ;;  %424 = vpow2.f32 %v207_v4  ;;  %v385_v51 = vsel %vm296_vm6, 1.0, %v436_v15 }
 0x202   :  { %v161_v59 = vsel %vm157_vm3, %v494_v13, 0.0 }
 0x203   :  { %v413_v52 = vpop.eup %412 }
 0x204   :  { %251 = vadd.xlane.f32.xlu0 %v413_v52  ;;  %v152_v54 = vpop.permute.xlu1 %151  ;;  %v415_v55 = vpop.eup %414 }
 0x205   :  { %vm158_vm4 = vcmp.eq.s32.totalorder %v582_v53, %v152_v54 }
 0x206   :  { %v162_v60 = vsel %vm158_vm4, %v486_v7, 0.0 }
 0x207   :  { %v417_v56 = vpop.eup %416 }
 0x208   :  { %253 = vadd.xlane.f32.xlu0 %v415_v55  ;;  %255 = vadd.xlane.f32.xlu1 %v417_v56  ;;  %v155_v57 = vpop.permute.xlu1 %154  ;;  %v419_v5 = vpop.eup %418 }
 0x209   :  { %vm159_vm5 = vcmp.eq.s32.totalorder %v582_v53, %v155_v57  ;;  %v213_v7 = vmul.f32 %v419_v5, %v209_v6  ;;  %v421_v8 = vpop.eup %420  ;;  %v275_v5 = vld [vmem:[#allocation2 + $0x18] sm:$0xff] }
 0x20a   :  { %v163_v61 = vsel %vm159_vm5, %v492_v12, 0.0  ;;  %v423_v12 = vpop.eup %422  ;;  %v214_v13 = vmul.f32 %v421_v8, %v210_v10  ;;  %v386_v8 = vsel %vm297_vm8, 1.0, %v436_v15 }
 0x20b   :  { %v425_v14 = vpop.eup %424  ;;  %v215_v20 = vmul.f32 %v423_v12, %v211_v17  ;;  %v388_v12 = vsel %vm299_vm9, 1.0, %v436_v15 }
 0x20c   :  { %164 = vadd.xlane.f32.xlu0 %v160_v58  ;;  %166 = vadd.xlane.f32.xlu1 %v161_v59  ;;  %v216_v21 = vmul.f32 %v425_v14, %v212_v18 }
 0x210   :  { %168 = vadd.xlane.f32.xlu0 %v162_v60  ;;  %170 = vadd.xlane.f32.xlu1 %v163_v61  ;;  %v323_v60 = vld [vmem:[%s643_s1 + $0x18] sm:$0xff]  ;;  %v273_v61 = vld [vmem:[#allocation2 + $0x8] sm:$0xff] }
 0x221   :  { %328 = vperm.xlu1 %405, %v321_v62  }
 0x225   :  { %331 = vperm.xlu1 %405, %v322_v63  }
 0x226   :  { %325 = vperm.xlu0 %404, %v320_v0  }
 0x28d   :  { %v250_v9 = vpop.xlane.xlu1 %249 }
 0x28e   :  { %v257_v11 = vadd.f32 %v250_v9, %v213_v7 }
 0x290   :  { %261 = vst.msk [vmem:[#allocation3] sm:$0xff] %vm25_vm1, %v257_v11 }
 0x291   :  { %v252_v16 = vpop.xlane.xlu0 %251 }
 0x292   :  { %v258_v19 = vadd.f32 %v252_v16, %v214_v13 }
 0x294   :  { %262 = vst.msk [vmem:[#allocation3 + $0x8] sm:$0xff] %vm25_vm1, %v258_v19 }
 0x295   :  { %v254_v22 = vpop.xlane.xlu0 %253  ;;  %v256_v23 = vpop.xlane.xlu1 %255 }
 0x296   :  { %v259_v24 = vadd.f32 %v254_v22, %v215_v20  ;;  %v260_v25 = vadd.f32 %v256_v23, %v216_v21 }
 0x297   :  { %v276_v28 = vld [vmem:[#allocation3] sm:$0xff] }
 0x298   :  { %263 = vst.msk [vmem:[#allocation3 + $0x10] sm:$0xff] %vm25_vm1, %v259_v24  ;;  %264 = vst.msk [vmem:[#allocation3 + $0x18] sm:$0xff] %vm25_vm1, %v260_v25  ;;  %426 = vlog2.f32 %v276_v28 }
 0x299   :  { %v165_v29 = vpop.xlane.xlu0 %164  ;;  %v167_v30 = vpop.xlane.xlu1 %166 }
 0x29a   :  { %v172_v31 = vadd.f32 %v165_v29, %v140_v26  ;;  %v173_v36 = vadd.f32 %v167_v30, %v141_v27 }
 0x29b   :  { %v277_v39 = vld [vmem:[#allocation3 + $0x8] sm:$0xff] }
 0x29c   :  { %177 = vst.msk [vmem:[#allocation4] sm:$0xff] %vm25_vm1, %v172_v31  ;;  %178 = vst.msk [vmem:[#allocation4 + $0x8] sm:$0xff] %vm25_vm1, %v173_v36  ;;  %428 = vlog2.f32 %v277_v39 }
 0x29d   :  { %v169_v40 = vpop.xlane.xlu0 %168  ;;  %v171_v41 = vpop.xlane.xlu1 %170 }
 0x29e   :  { %v174_v42 = vadd.f32 %v169_v40, %v142_v37  ;;  %v175_v43 = vadd.f32 %v171_v41, %v143_v38 }
 0x29f   :  { %v278_v44 = vld [vmem:[#allocation3 + $0x10] sm:$0xff]  ;;  %v279_v45 = vld [vmem:[#allocation3 + $0x18] sm:$0xff] }
 0x2a0   :  { %179 = vst.msk [vmem:[#allocation4 + $0x10] sm:$0xff] %vm25_vm1, %v174_v42  ;;  %180 = vst.msk [vmem:[#allocation4 + $0x18] sm:$0xff] %vm25_vm1, %v175_v43  ;;  %430 = vlog2.f32 %v278_v44 }
 0x2a1   :  { %432 = vlog2.f32 %v279_v45  ;;  %v329_v14 = vpop.permute.xlu1 %328 }
 0x2a2   :  { %v427_v46 = vpop.eup %426  ;;  %vm337_vm10 = vcmp.eq.s32.totalorder %v582_v53, %v329_v14 }
 0x2a3   :  { %v281_v47 = vmul.f32 0.6931472, %v427_v46  ;;  %v308_v52 = vld [vmem:[#allocation4] sm:$0xff]  ;;  %v309_v4 = vld [vmem:[#allocation4 + $0x8] sm:$0xff] }
 0x2a5   :  { %v288_v49 = vadd.f32 %v281_v47, %v272_v48  ;;  %v332_v33 = vpop.permute.xlu1 %331  ;;  %v326_v16 = vpop.permute.xlu0 %325 }
 0x2a6   :  { %v429_v50 = vpop.eup %428  ;;  %vm336_vm11 = vcmp.eq.s32.totalorder %v582_v53, %v326_v16  ;;  %vm338_vm12 = vcmp.eq.s32.totalorder %v582_v53, %v332_v33 }
 0x2a7   :  { %v312_v54 = vsub.f32 %v288_v49, %v308_v52  ;;  %v283_v56 = vmul.f32 0.6931472, %v429_v50  ;;  %v310_v2 = vld [vmem:[#allocation4 + $0x10] sm:$0xff]  ;;  %v311_v9 = vld [vmem:[#allocation4 + $0x18] sm:$0xff] }
 0x2a9   :  { %v316_v55 = vmul.f32 %v385_v51, %v312_v54  ;;  %v289_v63 = vadd.f32 %v283_v56, %v273_v61 }
 0x2aa   :  { %v431_v57 = vpop.eup %430 }
 0x2ab   :  { %v433_v58 = vpop.eup %432  ;;  %342 = vperm.xlu1 %405, %v316_v55   ;;  %v285_v59 = vmul.f32 0.6931472, %v431_v57  ;;  %v313_v34 = vsub.f32 %v289_v63, %v309_v4 }
 0x2ac   :  { %v287_v0 = vmul.f32 0.6931472, %v433_v58 }
 0x2ad   :  { %v290_v62 = vadd.f32 %v285_v59, %v274_v32  ;;  %v317_v10 = vmul.f32 %v386_v8, %v313_v34 }
 0x2ae   :  { %v291_v7 = vadd.f32 %v287_v0, %v275_v5 }
 0x2af   :  { %334 = vperm.xlu1 %405, %v323_v60   ;;  %v314_v3 = vsub.f32 %v290_v62, %v310_v2 }
 0x2b0   :  { %v315_v11 = vsub.f32 %v291_v7, %v311_v9 }
 0x2b1   :  { %v318_v6 = vmul.f32 %v387_v1, %v314_v3 }
 0x2b2   :  { %v319_v13 = vmul.f32 %v388_v12, %v315_v11 }
 0x2b3   :  { %352 = vperm.xlu0 %404, %v318_v6  }
 0x2b7   :  { %347 = vperm.xlu0 %404, %v317_v10  }
 0x2bb   :  { %357 = vperm.xlu0 %404, %v319_v13  }
 0x32a   :  { %v343_v17 = vpop.permute.xlu1 %342 }
 0x32b   :  { %v360_v20 = vsel %vm336_vm11, %v343_v17, 0.0 }
 0x32e   :  { %v335_v35 = vpop.permute.xlu1 %334 }
 0x32f   :  { %vm339_vm13 = vcmp.eq.s32.totalorder %v582_v53, %v335_v35 }
 0x332   :  { %v353_v18 = vpop.permute.xlu0 %352 }
 0x333   :  { %v362_v15 = vsel %vm338_vm12, %v353_v18, 0.0 }
 0x336   :  { %v348_v19 = vpop.permute.xlu0 %347 }
 0x337   :  { %v361_v21 = vsel %vm337_vm10, %v348_v19, 0.0 }
 0x338   :  { %v364_v22 = vadd.f32 %v361_v21, %v360_v20 }
 0x33a   :  { %v358_v23 = vpop.permute.xlu0 %357  ;;  %v365_v24 = vadd.f32 %v364_v22, %v362_v15 }
 0x33b   :  { %v363_v25 = vsel %vm339_vm13, %v358_v23, 0.0 }
 0x33c   :  { %v366_v26 = vadd.f32 %v365_v24, %v363_v25 }
 0x33e   :  { %v367_v27 = vrot.slane %v366_v26, 4 }
 0x340   :  { %v368_v28 = vadd.f32 %v367_v27, %v366_v26 }
 0x342   :  { %v369_v29 = vrot.slane %v368_v28, 2 }
 0x344   :  { %v370_v30 = vadd.f32 %v369_v29, %v368_v28 }
 0x346   :  { %v371_v31 = vrot.slane %v370_v30, 1 }
 0x348   :  { %v372_v36 = vadd.f32 %v371_v31, %v370_v30 }
 0x34a   :  { %373 = vst [vmem:[%s644_s5] sm:$0x1] %v372_v36 }

</bundles_post_ra>
